<compile_context>
chip_gen: v7x
topology: tpu7x:2x2x1
jax: 0.10.0
libtpu: 0.0.40
codegen_flags: <defaults>
</compile_context>

<pallas_src>
import functools

import numpy as np
import jax
import jax.numpy as jnp
from jax.experimental import pallas as pl
from jax.experimental.pallas import tpu as pltpu


def _round_up(x, m):
    return (x + m - 1) // m * m


_COMPILER_PARAMS = pltpu.CompilerParams(
    dimension_semantics=("parallel",),
    vmem_limit_bytes=32 * 1024 * 1024,
)


# ----------------------------- Pallas kernels -----------------------------

def _conv_relu_pool_kernel(w_ref, b_ref, p00_ref, p01_ref, p10_ref, p11_ref,
                           o_ref):
    """Fused conv-as-GEMM + bias + ReLU + 2x2 stride-2 max-pool epilogue.

    w:(C_out,K) bf16, p_q:(K,TILE_M) bf16 im2col patches of pool quadrant q,
    b:(C_out,1) f32, o:(C_out,TILE_M) f32 (lane-dense output).
    """
    w = w_ref[...]
    acc = jnp.dot(w, p00_ref[...], preferred_element_type=jnp.float32)
    acc = jnp.maximum(acc, jnp.dot(w, p01_ref[...],
                                   preferred_element_type=jnp.float32))
    acc = jnp.maximum(acc, jnp.dot(w, p10_ref[...],
                                   preferred_element_type=jnp.float32))
    acc = jnp.maximum(acc, jnp.dot(w, p11_ref[...],
                                   preferred_element_type=jnp.float32))
    # max_q(W@p_q + b) == max_q(W@p_q) + b ; relu is monotone.
    o_ref[...] = jnp.maximum(acc + b_ref[...], 0.0).astype(o_ref.dtype)


def _fc_stack_kernel(*refs, training, rate):
    """Fused fc1+ReLU(+dropout)+fc2+ReLU(+dropout)+fc3 on one batch tile."""
    if training:
        seed_ref, refs = refs[0], refs[1:]
        pltpu.prng_seed(seed_ref[0] + pl.program_id(0))
    (x_ref, w1_ref, b1_ref, w2_ref, b2_ref, w3_ref, b3_ref, o_ref) = refs

    def drop(h):
        if not training:
            return h
        # TODO(synk): TPU hardware PRNG; not bitwise identical to torch's RNG.
        thr = jnp.uint32(min(int(rate * (2 ** 32)), 2 ** 32 - 1))
        bits = pltpu.bitcast(pltpu.prng_random_bits(h.shape), jnp.uint32)
        scale = jnp.float32(1.0 / (1.0 - rate))
        return jnp.where(bits >= thr, h * scale, jnp.float32(0.0))

    h = jnp.dot(x_ref[...], w1_ref[...], preferred_element_type=jnp.float32)
    h = jnp.maximum(h + b1_ref[...], 0.0)
    h = drop(h)
    h = jnp.dot(h.astype(jnp.bfloat16), w2_ref[...],
                preferred_element_type=jnp.float32)
    h = jnp.maximum(h + b2_ref[...], 0.0)
    h = drop(h)
    o = jnp.dot(h.astype(jnp.bfloat16), w3_ref[...],
                preferred_element_type=jnp.float32)
    o_ref[...] = (o + b3_ref[...]).astype(o_ref.dtype)


# ------------------------------ layer wrappers -----------------------------

def conv_relu_pool(x, w_flat, b_col, kh, kw, tile_m=512):
    """'valid' conv (w_flat:(C_out, C*kh*kw)) + ReLU + 2x2/2 max pool.

    x:(B,C,H,W) f32 -> (B, C_out, (H-kh+1)//2, (W-kw+1)//2) f32.
    """
    B, C, H, W = x.shape
    C_out, K = w_flat.shape
    assert K == C * kh * kw
    OH, OW = H - kh + 1, W - kw + 1
    POH, POW = OH // 2, OW // 2
    M = B * POH * POW

    # Quadrant im2col, transposed: rows = (c,ky,kx), cols = (b,oh',ow').
    # TODO(synk): patch extraction stays XLA-side layout glue; an in-kernel
    # im2col would need lane/sublane relayouts that do not lower cleanly, so
    # the ~K-fold patch expansion is still paid in HBM traffic.
    def quad(dy, dx):
        cols = []
        for c in range(C):
            for ky in range(kh):
                for kx in range(kw):
                    v = x[:, c,
                          dy + ky: dy + ky + 2 * POH: 2,
                          dx + kx: dx + kx + 2 * POW: 2]           # (B,POH,POW)
                    cols.append(v.reshape(M))
        return jnp.stack(cols, axis=0).astype(jnp.bfloat16)         # (K, M)

    tile_m = min(tile_m, _round_up(M, 128))
    m_pad = _round_up(M, tile_m)
    patches = [jnp.pad(quad(dy, dx), ((0, 0), (0, m_pad - M)))
               for dy in (0, 1) for dx in (0, 1)]

    out = pl.pallas_call(
        _conv_relu_pool_kernel,
        out_shape=jax.ShapeDtypeStruct((C_out, m_pad), jnp.float32),
        grid=(m_pad // tile_m,),
        in_specs=[
            pl.BlockSpec((C_out, K), lambda i: (0, 0)),   # weights: VMEM-resident
            pl.BlockSpec((C_out, 1), lambda i: (0, 0)),   # bias
        ] + [pl.BlockSpec((K, tile_m), lambda i: (0, i)) for _ in range(4)],
        out_specs=pl.BlockSpec((C_out, tile_m), lambda i: (0, i)),
        compiler_params=_COMPILER_PARAMS,
    )(w_flat.astype(jnp.bfloat16), b_col.astype(jnp.float32), *patches)

    return out[:, :M].reshape(C_out, B, POH, POW).transpose(1, 0, 2, 3)


def fc_stack(x, w1, b1, w2, b2, w3, b3, *, training=False, rate=0.5, seed=0,
             tile_b=256):
    """fc3(drop(relu(fc2(drop(relu(fc1(x)))))))   x:(B,256) -> (B,10)."""
    B, D = x.shape
    N_out = w3.shape[1]
    tile_b = min(tile_b, _round_up(B, 16))
    b_pad = _round_up(B, tile_b)
    x_p = jnp.pad(x, ((0, b_pad - B), (0, 0))).astype(jnp.bfloat16)

    in_specs, args = [], []
    if training:
        in_specs.append(pl.BlockSpec(memory_space=pltpu.MemorySpace.SMEM))
        args.append(jnp.asarray([seed], jnp.int32))
    in_specs += [
        pl.BlockSpec((tile_b, D), lambda i: (i, 0)),
        pl.BlockSpec(w1.shape, lambda i: (0, 0)),
        pl.BlockSpec((1, w1.shape[1]), lambda i: (0, 0)),
        pl.BlockSpec(w2.shape, lambda i: (0, 0)),
        pl.BlockSpec((1, w2.shape[1]), lambda i: (0, 0)),
        pl.BlockSpec(w3.shape, lambda i: (0, 0)),
        pl.BlockSpec((1, w3.shape[1]), lambda i: (0, 0)),
    ]
    args += [x_p,
             w1.astype(jnp.bfloat16), b1.astype(jnp.float32),
             w2.astype(jnp.bfloat16), b2.astype(jnp.float32),
             w3.astype(jnp.bfloat16), b3.astype(jnp.float32)]

    out = pl.pallas_call(
        functools.partial(_fc_stack_kernel, training=training, rate=rate),
        out_shape=jax.ShapeDtypeStruct((b_pad, N_out), jnp.float32),
        grid=(b_pad // tile_b,),
        in_specs=in_specs,
        out_specs=pl.BlockSpec((tile_b, N_out), lambda i: (i, 0)),
        compiler_params=_COMPILER_PARAMS,
    )(*args)
    return out[:B]


# ------------------------------- model glue --------------------------------

def init_params(key):
    """Deterministic init mimicking PyTorch's default U(-1/sqrt(fan_in), +)."""
    def uniform(k, shape, fan_in):
        bound = 1.0 / np.sqrt(fan_in)
        return jax.random.uniform(k, shape, jnp.float32, -bound, bound)

    ks = jax.random.split(key, 10)
    return {
        "conv1_w": uniform(ks[0], (6, 1, 5, 5), 1 * 5 * 5),
        "conv1_b": uniform(ks[1], (6,), 1 * 5 * 5),
        "conv2_w": uniform(ks[2], (16, 6, 5, 5), 6 * 5 * 5),
        "conv2_b": uniform(ks[3], (16,), 6 * 5 * 5),
        "fc1_w": uniform(ks[4], (120, 16 * 4 * 4), 16 * 4 * 4),
        "fc1_b": uniform(ks[5], (120,), 16 * 4 * 4),
        "fc2_w": uniform(ks[6], (84, 120), 120),
        "fc2_b": uniform(ks[7], (84,), 120),
        "fc3_w": uniform(ks[8], (10, 84), 84),
        "fc3_b": uniform(ks[9], (10,), 84),
    }


def prepare_params(params):
    """One-time weight prep: conv kernels flattened to (C_out, C_in*KH*KW),
    fc weights transposed, MXU operands cast to bf16, biases reshaped."""
    return {
        "c1_w": params["conv1_w"].reshape(6, -1).astype(jnp.bfloat16),   # (6,25)
        "c1_b": params["conv1_b"].reshape(6, 1).astype(jnp.float32),
        "c2_w": params["conv2_w"].reshape(16, -1).astype(jnp.bfloat16),  # (16,150)
        "c2_b": params["conv2_b"].reshape(16, 1).astype(jnp.float32),
        "fc1_w": params["fc1_w"].T.astype(jnp.bfloat16),                 # (256,120)
        "fc1_b": params["fc1_b"].reshape(1, -1).astype(jnp.float32),
        "fc2_w": params["fc2_w"].T.astype(jnp.bfloat16),                 # (120,84)
        "fc2_b": params["fc2_b"].reshape(1, -1).astype(jnp.float32),
        "fc3_w": params["fc3_w"].T.astype(jnp.bfloat16),                 # (84,10)
        "fc3_b": params["fc3_b"].reshape(1, -1).astype(jnp.float32),
    }


def convnet_forward(prep, x, training=False, dropout_seed=0):
    x = x.reshape(-1, 1, 28, 28).astype(jnp.float32)          # = x.view(-1,1,28,28)
    y = conv_relu_pool(x, prep["c1_w"], prep["c1_b"], 5, 5)   # (B, 6, 12, 12)
    y = conv_relu_pool(y, prep["c2_w"], prep["c2_b"], 5, 5)   # (B, 16, 4, 4)
    B = y.shape[0]
    y = y.reshape(B, 16 * 4 * 4)                              # = x.view(-1, 256)
    return fc_stack(y, prep["fc1_w"], prep["fc1_b"],
                    prep["fc2_w"], prep["fc2_b"],
                    prep["fc3_w"], prep["fc3_b"],
                    training=training, seed=dropout_seed)


def reference_forward(params, x):
    """Pure-JAX f32 reference matching the PyTorch module in eval mode."""
    def pool(y):
        return jnp.maximum(
            jnp.maximum(y[:, :, 0::2, 0::2], y[:, :, 0::2, 1::2]),
            jnp.maximum(y[:, :, 1::2, 0::2], y[:, :, 1::2, 1::2]))

    dn = ("NCHW", "OIHW", "NCHW")
    x = x.reshape(-1, 1, 28, 28).astype(jnp.float32)
    y = jax.lax.conv_general_dilated(x, params["conv1_w"], (1, 1), "VALID",
                                     dimension_numbers=dn)
    y = pool(jax.nn.relu(y + params["conv1_b"].reshape(1, -1, 1, 1)))
    y = jax.lax.conv_general_dilated(y, params["conv2_w"], (1, 1), "VALID",
                                     dimension_numbers=dn)
    y = pool(jax.nn.relu(y + params["conv2_b"].reshape(1, -1, 1, 1)))
    y = y.reshape(y.shape[0], -1)
    y = jax.nn.relu(y @ params["fc1_w"].T + params["fc1_b"])
    y = jax.nn.relu(y @ params["fc2_w"].T + params["fc2_b"])
    return y @ params["fc3_w"].T + params["fc3_b"]


if __name__ == "__main__":
    key = jax.random.PRNGKey(0)
    pkey, xkey = jax.random.split(key)
    params = init_params(pkey)
    prep = prepare_params(params)
    x = jax.random.normal(xkey, (2, 1, 28, 28), jnp.float32)

    forward = jax.jit(functools.partial(convnet_forward, training=False))
    logits = jax.block_until_ready(forward(prep, x))

    assert logits.shape == (2, 10), logits.shape
    assert bool(jnp.all(jnp.isfinite(logits)))

    # Loose check against a pure-JAX f32 reference (bf16 MXU operands with f32
    # accumulation -> not bitwise identical; tolerance sized accordingly).
    ref = reference_forward(params, x)
    err = float(jnp.max(jnp.abs(logits - ref)))
    assert err < 0.3, f"max abs error vs reference: {err}"
    print("KERNEL_OK")
</pallas_src>

<mosaic_0001>
module attributes {stable_mosaic.version = 11 : i64} {
  func.func @_conv_relu_pool_kernel(%arg0: i32, %arg1: memref<6x25xbf16, #tpu.memory_space<vmem>>, %arg2: memref<6x1xf32, #tpu.memory_space<vmem>>, %arg3: memref<25x384xbf16, #tpu.memory_space<vmem>>, %arg4: memref<25x384xbf16, #tpu.memory_space<vmem>>, %arg5: memref<25x384xbf16, #tpu.memory_space<vmem>>, %arg6: memref<25x384xbf16, #tpu.memory_space<vmem>>, %arg7: memref<6x384xf32, #tpu.memory_space<vmem>>) attributes {dimension_semantics = [#tpu.dimension_semantics<parallel>], iteration_bounds = array<i64: 1>, scalar_prefetch = 0 : i64, scratch_operands = 0 : i64, tpu.core_type = #tpu.core_type<tc>, window_params = [{pipeline_mode = #tpu.pipeline_mode<synchronous>, transform_indices = @transform_0, window_bounds = array<i64: 6, 25>}, {pipeline_mode = #tpu.pipeline_mode<synchronous>, transform_indices = @transform_1, window_bounds = array<i64: 6, 1>}, {transform_indices = @transform_2, window_bounds = array<i64: 25, 384>}, {transform_indices = @transform_3, window_bounds = array<i64: 25, 384>}, {transform_indices = @transform_4, window_bounds = array<i64: 25, 384>}, {transform_indices = @transform_5, window_bounds = array<i64: 25, 384>}, {transform_indices = @transform_6, window_bounds = array<i64: 6, 384>}]} {
    %c0 = arith.constant 0 : index
    %c0_0 = arith.constant 0 : index
    %0 = vector.load %arg1[%c0, %c0_0] : memref<6x25xbf16, #tpu.memory_space<vmem>>, vector<6x25xbf16>
    %c0_1 = arith.constant 0 : index
    %c0_2 = arith.constant 0 : index
    %1 = vector.load %arg3[%c0_1, %c0_2] : memref<25x384xbf16, #tpu.memory_space<vmem>>, vector<25x384xbf16>
    %cst = arith.constant dense<0.000000e+00> : vector<6x384xf32>
    %2 = tpu.matmul %0, %1, %cst {dimension_numbers = #tpu.dot_dimension_numbers<[1], [0], [0], [1], [0, 0, 1, 1], [], []>} : vector<6x25xbf16>, vector<25x384xbf16>, vector<6x384xf32> -> vector<6x384xf32>
    %c0_3 = arith.constant 0 : index
    %c0_4 = arith.constant 0 : index
    %3 = vector.load %arg4[%c0_3, %c0_4] : memref<25x384xbf16, #tpu.memory_space<vmem>>, vector<25x384xbf16>
    %cst_5 = arith.constant dense<0.000000e+00> : vector<6x384xf32>
    %4 = tpu.matmul %0, %3, %cst_5 {dimension_numbers = #tpu.dot_dimension_numbers<[1], [0], [0], [1], [0, 0, 1, 1], [], []>} : vector<6x25xbf16>, vector<25x384xbf16>, vector<6x384xf32> -> vector<6x384xf32>
    %5 = arith.maximumf %2, %4 : vector<6x384xf32>
    %c0_6 = arith.constant 0 : index
    %c0_7 = arith.constant 0 : index
    %6 = vector.load %arg5[%c0_6, %c0_7] : memref<25x384xbf16, #tpu.memory_space<vmem>>, vector<25x384xbf16>
    %cst_8 = arith.constant dense<0.000000e+00> : vector<6x384xf32>
    %7 = tpu.matmul %0, %6, %cst_8 {dimension_numbers = #tpu.dot_dimension_numbers<[1], [0], [0], [1], [0, 0, 1, 1], [], []>} : vector<6x25xbf16>, vector<25x384xbf16>, vector<6x384xf32> -> vector<6x384xf32>
    %8 = arith.maximumf %5, %7 : vector<6x384xf32>
    %c0_9 = arith.constant 0 : index
    %c0_10 = arith.constant 0 : index
    %9 = vector.load %arg6[%c0_9, %c0_10] : memref<25x384xbf16, #tpu.memory_space<vmem>>, vector<25x384xbf16>
    %cst_11 = arith.constant dense<0.000000e+00> : vector<6x384xf32>
    %10 = tpu.matmul %0, %9, %cst_11 {dimension_numbers = #tpu.dot_dimension_numbers<[1], [0], [0], [1], [0, 0, 1, 1], [], []>} : vector<6x25xbf16>, vector<25x384xbf16>, vector<6x384xf32> -> vector<6x384xf32>
    %11 = arith.maximumf %8, %10 : vector<6x384xf32>
    %c0_12 = arith.constant 0 : index
    %c0_13 = arith.constant 0 : index
    %12 = vector.load %arg2[%c0_12, %c0_13] : memref<6x1xf32, #tpu.memory_space<vmem>>, vector<6x1xf32>
    %13 = vector.broadcast %12 : vector<6x1xf32> to vector<6x384xf32>
    %14 = arith.addf %11, %13 : vector<6x384xf32>
    %cst_14 = arith.constant 0.000000e+00 : f32
    %15 = vector.broadcast %cst_14 : f32 to vector<6x384xf32>
    %16 = arith.maximumf %14, %15 : vector<6x384xf32>
    %c0_15 = arith.constant 0 : index
    %c0_16 = arith.constant 0 : index
    %17 = vector.load %arg7[%c0_15, %c0_16] : memref<6x384xf32, #tpu.memory_space<vmem>>, vector<6x384xf32>
    tpu.vector_store %arg7[%c0_15, %c0_16], %16 {strides = array<i32>} : memref<6x384xf32, #tpu.memory_space<vmem>>, vector<6x384xf32>,
    return
  }
  func.func @transform_0(%arg0: i32) -> (i32, i32) {
    %c0_i32 = arith.constant 0 : i32
    %c0_i32_0 = arith.constant 0 : i32
    %c0_i32_1 = arith.constant 0 : i32
    return %c0_i32, %c0_i32_0 : i32, i32
  }
  func.func @transform_1(%arg0: i32) -> (i32, i32) {
    %c0_i32 = arith.constant 0 : i32
    %c0_i32_0 = arith.constant 0 : i32
    %c0_i32_1 = arith.constant 0 : i32
    return %c0_i32, %c0_i32_0 : i32, i32
  }
  func.func @transform_2(%arg0: i32) -> (i32, i32) {
    %c0_i32 = arith.constant 0 : i32
    %c0_i32_0 = arith.constant 0 : i32
    return %c0_i32, %arg0 : i32, i32
  }
  func.func @transform_3(%arg0: i32) -> (i32, i32) {
    %c0_i32 = arith.constant 0 : i32
    %c0_i32_0 = arith.constant 0 : i32
    return %c0_i32, %arg0 : i32, i32
  }
  func.func @transform_4(%arg0: i32) -> (i32, i32) {
    %c0_i32 = arith.constant 0 : i32
    %c0_i32_0 = arith.constant 0 : i32
    return %c0_i32, %arg0 : i32, i32
  }
  func.func @transform_5(%arg0: i32) -> (i32, i32) {
    %c0_i32 = arith.constant 0 : i32
    %c0_i32_0 = arith.constant 0 : i32
    return %c0_i32, %arg0 : i32, i32
  }
  func.func @transform_6(%arg0: i32) -> (i32, i32) {
    %c0_i32 = arith.constant 0 : i32
    %c0_i32_0 = arith.constant 0 : i32
    return %c0_i32, %arg0 : i32, i32
  }
}

module attributes {stable_mosaic.version = 11 : i64} {
  func.func @_conv_relu_pool_kernel(%arg0: i32, %arg1: memref<16x150xbf16, #tpu.memory_space<vmem>>, %arg2: memref<16x1xf32, #tpu.memory_space<vmem>>, %arg3: memref<150x128xbf16, #tpu.memory_space<vmem>>, %arg4: memref<150x128xbf16, #tpu.memory_space<vmem>>, %arg5: memref<150x128xbf16, #tpu.memory_space<vmem>>, %arg6: memref<150x128xbf16, #tpu.memory_space<vmem>>, %arg7: memref<16x128xf32, #tpu.memory_space<vmem>>) attributes {dimension_semantics = [#tpu.dimension_semantics<parallel>], iteration_bounds = array<i64: 1>, scalar_prefetch = 0 : i64, scratch_operands = 0 : i64, tpu.core_type = #tpu.core_type<tc>, window_params = [{pipeline_mode = #tpu.pipeline_mode<synchronous>, transform_indices = @transform_0, window_bounds = array<i64: 16, 150>}, {pipeline_mode = #tpu.pipeline_mode<synchronous>, transform_indices = @transform_1, window_bounds = array<i64: 16, 1>}, {transform_indices = @transform_2, window_bounds = array<i64: 150, 128>}, {transform_indices = @transform_3, window_bounds = array<i64: 150, 128>}, {transform_indices = @transform_4, window_bounds = array<i64: 150, 128>}, {transform_indices = @transform_5, window_bounds = array<i64: 150, 128>}, {transform_indices = @transform_6, window_bounds = array<i64: 16, 128>}]} {
    %c0 = arith.constant 0 : index
    %c0_0 = arith.constant 0 : index
    %0 = vector.load %arg1[%c0, %c0_0] : memref<16x150xbf16, #tpu.memory_space<vmem>>, vector<16x150xbf16>
    %c0_1 = arith.constant 0 : index
    %c0_2 = arith.constant 0 : index
    %1 = vector.load %arg3[%c0_1, %c0_2] : memref<150x128xbf16, #tpu.memory_space<vmem>>, vector<150x128xbf16>
    %cst = arith.constant dense<0.000000e+00> : vector<16x128xf32>
    %2 = tpu.matmul %0, %1, %cst {dimension_numbers = #tpu.dot_dimension_numbers<[1], [0], [0], [1], [0, 0, 1, 1], [], []>} : vector<16x150xbf16>, vector<150x128xbf16>, vector<16x128xf32> -> vector<16x128xf32>
    %c0_3 = arith.constant 0 : index
    %c0_4 = arith.constant 0 : index
    %3 = vector.load %arg4[%c0_3, %c0_4] : memref<150x128xbf16, #tpu.memory_space<vmem>>, vector<150x128xbf16>
    %cst_5 = arith.constant dense<0.000000e+00> : vector<16x128xf32>
    %4 = tpu.matmul %0, %3, %cst_5 {dimension_numbers = #tpu.dot_dimension_numbers<[1], [0], [0], [1], [0, 0, 1, 1], [], []>} : vector<16x150xbf16>, vector<150x128xbf16>, vector<16x128xf32> -> vector<16x128xf32>
    %5 = arith.maximumf %2, %4 : vector<16x128xf32>
    %c0_6 = arith.constant 0 : index
    %c0_7 = arith.constant 0 : index
    %6 = vector.load %arg5[%c0_6, %c0_7] : memref<150x128xbf16, #tpu.memory_space<vmem>>, vector<150x128xbf16>
    %cst_8 = arith.constant dense<0.000000e+00> : vector<16x128xf32>
    %7 = tpu.matmul %0, %6, %cst_8 {dimension_numbers = #tpu.dot_dimension_numbers<[1], [0], [0], [1], [0, 0, 1, 1], [], []>} : vector<16x150xbf16>, vector<150x128xbf16>, vector<16x128xf32> -> vector<16x128xf32>
    %8 = arith.maximumf %5, %7 : vector<16x128xf32>
    %c0_9 = arith.constant 0 : index
    %c0_10 = arith.constant 0 : index
    %9 = vector.load %arg6[%c0_9, %c0_10] : memref<150x128xbf16, #tpu.memory_space<vmem>>, vector<150x128xbf16>
    %cst_11 = arith.constant dense<0.000000e+00> : vector<16x128xf32>
    %10 = tpu.matmul %0, %9, %cst_11 {dimension_numbers = #tpu.dot_dimension_numbers<[1], [0], [0], [1], [0, 0, 1, 1], [], []>} : vector<16x150xbf16>, vector<150x128xbf16>, vector<16x128xf32> -> vector<16x128xf32>
    %11 = arith.maximumf %8, %10 : vector<16x128xf32>
    %c0_12 = arith.constant 0 : index
    %c0_13 = arith.constant 0 : index
    %12 = vector.load %arg2[%c0_12, %c0_13] : memref<16x1xf32, #tpu.memory_space<vmem>>, vector<16x1xf32>
    %13 = vector.broadcast %12 : vector<16x1xf32> to vector<16x128xf32>
    %14 = arith.addf %11, %13 : vector<16x128xf32>
    %cst_14 = arith.constant 0.000000e+00 : f32
    %15 = vector.broadcast %cst_14 : f32 to vector<16x128xf32>
    %16 = arith.maximumf %14, %15 : vector<16x128xf32>
    %c0_15 = arith.constant 0 : index
    %c0_16 = arith.constant 0 : index
    %17 = vector.load %arg7[%c0_15, %c0_16] : memref<16x128xf32, #tpu.memory_space<vmem>>, vector<16x128xf32>
    tpu.vector_store %arg7[%c0_15, %c0_16], %16 {strides = array<i32>} : memref<16x128xf32, #tpu.memory_space<vmem>>, vector<16x128xf32>,
    return
  }
  func.func @transform_0(%arg0: i32) -> (i32, i32) {
    %c0_i32 = arith.constant 0 : i32
    %c0_i32_0 = arith.constant 0 : i32
    %c0_i32_1 = arith.constant 0 : i32
    return %c0_i32, %c0_i32_0 : i32, i32
  }
  func.func @transform_1(%arg0: i32) -> (i32, i32) {
    %c0_i32 = arith.constant 0 : i32
    %c0_i32_0 = arith.constant 0 : i32
    %c0_i32_1 = arith.constant 0 : i32
    return %c0_i32, %c0_i32_0 : i32, i32
  }
  func.func @transform_2(%arg0: i32) -> (i32, i32) {
    %c0_i32 = arith.constant 0 : i32
    %c0_i32_0 = arith.constant 0 : i32
    return %c0_i32, %arg0 : i32, i32
  }
  func.func @transform_3(%arg0: i32) -> (i32, i32) {
    %c0_i32 = arith.constant 0 : i32
    %c0_i32_0 = arith.constant 0 : i32
    return %c0_i32, %arg0 : i32, i32
  }
  func.func @transform_4(%arg0: i32) -> (i32, i32) {
    %c0_i32 = arith.constant 0 : i32
    %c0_i32_0 = arith.constant 0 : i32
    return %c0_i32, %arg0 : i32, i32
  }
  func.func @transform_5(%arg0: i32) -> (i32, i32) {
    %c0_i32 = arith.constant 0 : i32
    %c0_i32_0 = arith.constant 0 : i32
    return %c0_i32, %arg0 : i32, i32
  }
  func.func @transform_6(%arg0: i32) -> (i32, i32) {
    %c0_i32 = arith.constant 0 : i32
    %c0_i32_0 = arith.constant 0 : i32
    return %c0_i32, %arg0 : i32, i32
  }
}

module attributes {stable_mosaic.version = 11 : i64} {
  func.func @_fc_stack_kernel(%arg0: i32, %arg1: memref<16x256xbf16, #tpu.memory_space<vmem>>, %arg2: memref<256x120xbf16, #tpu.memory_space<vmem>>, %arg3: memref<1x120xf32, #tpu.memory_space<vmem>>, %arg4: memref<120x84xbf16, #tpu.memory_space<vmem>>, %arg5: memref<1x84xf32, #tpu.memory_space<vmem>>, %arg6: memref<84x10xbf16, #tpu.memory_space<vmem>>, %arg7: memref<1x10xf32, #tpu.memory_space<vmem>>, %arg8: memref<16x10xf32, #tpu.memory_space<vmem>>) attributes {dimension_semantics = [#tpu.dimension_semantics<parallel>], iteration_bounds = array<i64: 1>, scalar_prefetch = 0 : i64, scratch_operands = 0 : i64, tpu.core_type = #tpu.core_type<tc>, window_params = [{transform_indices = @transform_0, window_bounds = array<i64: 16, 256>}, {pipeline_mode = #tpu.pipeline_mode<synchronous>, transform_indices = @transform_1, window_bounds = array<i64: 256, 120>}, {pipeline_mode = #tpu.pipeline_mode<synchronous>, transform_indices = @transform_2, window_bounds = array<i64: 1, 120>}, {pipeline_mode = #tpu.pipeline_mode<synchronous>, transform_indices = @transform_3, window_bounds = array<i64: 120, 84>}, {pipeline_mode = #tpu.pipeline_mode<synchronous>, transform_indices = @transform_4, window_bounds = array<i64: 1, 84>}, {pipeline_mode = #tpu.pipeline_mode<synchronous>, transform_indices = @transform_5, window_bounds = array<i64: 84, 10>}, {pipeline_mode = #tpu.pipeline_mode<synchronous>, transform_indices = @transform_6, window_bounds = array<i64: 1, 10>}, {transform_indices = @transform_7, window_bounds = array<i64: 16, 10>}]} {
    %c0 = arith.constant 0 : index
    %c0_0 = arith.constant 0 : index
    %0 = vector.load %arg1[%c0, %c0_0] : memref<16x256xbf16, #tpu.memory_space<vmem>>, vector<16x256xbf16>
    %c0_1 = arith.constant 0 : index
    %c0_2 = arith.constant 0 : index
    %1 = vector.load %arg2[%c0_1, %c0_2] : memref<256x120xbf16, #tpu.memory_space<vmem>>, vector<256x120xbf16>
    %cst = arith.constant dense<0.000000e+00> : vector<16x120xf32>
    %2 = tpu.matmul %0, %1, %cst {dimension_numbers = #tpu.dot_dimension_numbers<[1], [0], [0], [1], [0, 0, 1, 1], [], []>} : vector<16x256xbf16>, vector<256x120xbf16>, vector<16x120xf32> -> vector<16x120xf32>
    %c0_3 = arith.constant 0 : index
    %c0_4 = arith.constant 0 : index
    %3 = vector.load %arg3[%c0_3, %c0_4] : memref<1x120xf32, #tpu.memory_space<vmem>>, vector<1x120xf32>
    %4 = vector.broadcast %3 : vector<1x120xf32> to vector<16x120xf32>
    %5 = arith.addf %2, %4 : vector<16x120xf32>
    %cst_5 = arith.constant 0.000000e+00 : f32
    %6 = vector.broadcast %cst_5 : f32 to vector<16x120xf32>
    %7 = arith.maximumf %5, %6 : vector<16x120xf32>
    %8 = arith.truncf %7 : vector<16x120xf32> to vector<16x120xbf16>
    %c0_6 = arith.constant 0 : index
    %c0_7 = arith.constant 0 : index
    %9 = vector.load %arg4[%c0_6, %c0_7] : memref<120x84xbf16, #tpu.memory_space<vmem>>, vector<120x84xbf16>
    %cst_8 = arith.constant dense<0.000000e+00> : vector<16x84xf32>
    %10 = tpu.matmul %8, %9, %cst_8 {dimension_numbers = #tpu.dot_dimension_numbers<[1], [0], [0], [1], [0, 0, 1, 1], [], []>} : vector<16x120xbf16>, vector<120x84xbf16>, vector<16x84xf32> -> vector<16x84xf32>
    %c0_9 = arith.constant 0 : index
    %c0_10 = arith.constant 0 : index
    %11 = vector.load %arg5[%c0_9, %c0_10] : memref<1x84xf32, #tpu.memory_space<vmem>>, vector<1x84xf32>
    %12 = vector.broadcast %11 : vector<1x84xf32> to vector<16x84xf32>
    %13 = arith.addf %10, %12 : vector<16x84xf32>
    %cst_11 = arith.constant 0.000000e+00 : f32
    %14 = vector.broadcast %cst_11 : f32 to vector<16x84xf32>
    %15 = arith.maximumf %13, %14 : vector<16x84xf32>
    %16 = arith.truncf %15 : vector<16x84xf32> to vector<16x84xbf16>
    %c0_12 = arith.constant 0 : index
    %c0_13 = arith.constant 0 : index
    %17 = vector.load %arg6[%c0_12, %c0_13] : memref<84x10xbf16, #tpu.memory_space<vmem>>, vector<84x10xbf16>
    %cst_14 = arith.constant dense<0.000000e+00> : vector<16x10xf32>
    %18 = tpu.matmul %16, %17, %cst_14 {dimension_numbers = #tpu.dot_dimension_numbers<[1], [0], [0], [1], [0, 0, 1, 1], [], []>} : vector<16x84xbf16>, vector<84x10xbf16>, vector<16x10xf32> -> vector<16x10xf32>
    %c0_15 = arith.constant 0 : index
    %c0_16 = arith.constant 0 : index
    %19 = vector.load %arg7[%c0_15, %c0_16] : memref<1x10xf32, #tpu.memory_space<vmem>>, vector<1x10xf32>
    %20 = vector.broadcast %19 : vector<1x10xf32> to vector<16x10xf32>
    %21 = arith.addf %18, %20 : vector<16x10xf32>
    %c0_17 = arith.constant 0 : index
    %c0_18 = arith.constant 0 : index
    %22 = vector.load %arg8[%c0_17, %c0_18] : memref<16x10xf32, #tpu.memory_space<vmem>>, vector<16x10xf32>
    tpu.vector_store %arg8[%c0_17, %c0_18], %21 {strides = array<i32>} : memref<16x10xf32, #tpu.memory_space<vmem>>, vector<16x10xf32>,
    return
  }
  func.func @transform_0(%arg0: i32) -> (i32, i32) {
    %c0_i32 = arith.constant 0 : i32
    %c0_i32_0 = arith.constant 0 : i32
    return %arg0, %c0_i32 : i32, i32
  }
  func.func @transform_1(%arg0: i32) -> (i32, i32) {
    %c0_i32 = arith.constant 0 : i32
    %c0_i32_0 = arith.constant 0 : i32
    %c0_i32_1 = arith.constant 0 : i32
    return %c0_i32, %c0_i32_0 : i32, i32
  }
  func.func @transform_2(%arg0: i32) -> (i32, i32) {
    %c0_i32 = arith.constant 0 : i32
    %c0_i32_0 = arith.constant 0 : i32
    %c0_i32_1 = arith.constant 0 : i32
    return %c0_i32, %c0_i32_0 : i32, i32
  }
  func.func @transform_3(%arg0: i32) -> (i32, i32) {
    %c0_i32 = arith.constant 0 : i32
    %c0_i32_0 = arith.constant 0 : i32
    %c0_i32_1 = arith.constant 0 : i32
    return %c0_i32, %c0_i32_0 : i32, i32
  }
  func.func @transform_4(%arg0: i32) -> (i32, i32) {
    %c0_i32 = arith.constant 0 : i32
    %c0_i32_0 = arith.constant 0 : i32
    %c0_i32_1 = arith.constant 0 : i32
    return %c0_i32, %c0_i32_0 : i32, i32
  }
  func.func @transform_5(%arg0: i32) -> (i32, i32) {
    %c0_i32 = arith.constant 0 : i32
    %c0_i32_0 = arith.constant 0 : i32
    %c0_i32_1 = arith.constant 0 : i32
    return %c0_i32, %c0_i32_0 : i32, i32
  }
  func.func @transform_6(%arg0: i32) -> (i32, i32) {
    %c0_i32 = arith.constant 0 : i32
    %c0_i32_0 = arith.constant 0 : i32
    %c0_i32_1 = arith.constant 0 : i32
    return %c0_i32, %c0_i32_0 : i32, i32
  }
  func.func @transform_7(%arg0: i32) -> (i32, i32) {
    %c0_i32 = arith.constant 0 : i32
    %c0_i32_0 = arith.constant 0 : i32
    return %arg0, %c0_i32 : i32, i32
  }
}

</mosaic_0001>

<bundles_post_ra>
// kernel: squeeze.27
= control target key start
LH: loop header
LB: loop body
LE: loop exit
PB: predicated region body
PF: predicated region fallthrough
CT: control target
= control target key end

     0   :  { %s296_s10 = smov 112   ;;  %vm72_vm0 = vcmask 31744   ;;  %s297_s11 = smov 88   ;;  %vm76_vm1 = vcmask 64512   ;;  %vm66_vm2 = vcmask 97280   ;;  %vm79_vm3 = vcmask 1048544   ;;  %s348_s0 = inlined_call_operand.vmem [shape: bf16[2,12,12], index: 0, kind: input, shape index: {}]   ;;  %s349_s1 = inlined_call_operand.vmem [shape: bf16[1,288], index: 1, kind: output, shape index: {}]  }
   0x1   :  { %v270_v0 = vld [vmem:[%s348_s0 + $0x8] sm:$0xff]   ;;  %v267_v1 = vld [vmem:[%s348_s0] sm:$0xff]   ;;  %s295_s0 = smov 100   ;;  %s298_s12 = smov 108   ;;  %vm93_vm4 = vcmask 1048512   ;;  %vm99_vm5 = vcmask 1015680  }
   0x2   :  { %v264_v2 = vunpack.c.l.bf16 %v270_v0  ;;  %v265_v3 = vunpack.c.h.bf16 %v270_v0  ;;  %v269_v4 = vunpack.c.h.bf16 %v267_v1  ;;  %v268_v5 = vunpack.c.l.bf16 %v267_v1  ;;  %s299_s13 = smov 124   ;;  %s300_s14 = smov 96  }
   0x3   :  { %s301_s15 = smov 120   ;;  %s302_s16 = smov 84   ;;  %vm106_vm6 = vcmask 982880   ;;  %vm112_vm7 = vcmask 917280   ;;  %vm119_vm8 = vcmask 884480   ;;  %vm125_vm9 = vcmask 818880  }
   0x4   :  { %36 = vst [vmem:[#allocation1 + $0x10] sm:$0xff] %v264_v2  ;;  %20 = vst [vmem:[#allocation1 + $0x18] sm:$0xff] %v265_v3  ;;  %s303_s17 = smov 76   ;;  %s304_s18 = smov 72   ;;  %vm132_vm10 = vcmask 786080   ;;  %vm138_vm11 = vcmask 720480  }
   0x5   :  { %51 = vst [vmem:[#allocation1 + $0x8] sm:$0xff] %v269_v4  ;;  %64 = vst [vmem:[#allocation1] sm:$0xff] %v268_v5  ;;  %s305_s19 = smov 64   ;;  %s306_s20 = smov 60   ;;  %vm145_vm12 = vcmask 687680   ;;  %vm151_vm13 = vcmask 622080  }
   0x6   :  { %s307_s21 = smov 52   ;;  %s308_s22 = smov 48   ;;  %vm158_vm14 = vcmask 589280   ;;  %vm164_vm15 = vcmask 523680   ;;  %v318_v59 = vmov 0.0  }
   0x7   :  { %s309_s23 = smov 40   ;;  %s310_s24 = smov 36  }
   0x8   :  { %s311_s25 = smov 28   ;;  %s312_s26 = smov 24  }
   0x9   :  { %s313_s27 = smov 20   ;;  %s314_s28 = smov 16  }
   0xa   :  { %s315_s29 = smov 12   ;;  %s316_s30 = smov 8  }
   0xb   :  { %v109_v6 = vld [vmem:[#allocation1 + $0x17] sm:$0x1]   ;;  %v96_v7 = vld [vmem:[#allocation1 + $0x18] sm:$0x1]   ;;  %v122_v8 = vld [vmem:[#allocation1 + $0x16] sm:$0x1]  }
   0xc   :  { %110 = vrot.lane.b32.xlu0 %v109_v6, %s295_s0  ;;  %97 = vrot.lane.b32.xlu1 %v96_v7, %s296_s10  ;;  %v103_v9 = vld [vmem:[#allocation1 + $0x9] sm:$0x1]   ;;  %v69_v10 = vld [vmem:[#allocation1 + $0x19] sm:$0x1]   ;;  %v116_v13 = vld [vmem:[#allocation1 + $0x8] sm:$0x1]  }
   0xd   :  { %v71_v11 = vld [vmem:[#allocation1 + $0x19] sm:$0x1]   ;;  %v83_v14 = vld [vmem:[#allocation1 + $0xa] sm:$0x1]   ;;  %v65_v16 = vld [vmem:[#allocation1] sm:$0x1]  }
   0xe   :  { %v73_v12 = vsel %vm72_vm0, %v71_v11, %v69_v10  ;;  %v85_v15 = vld [vmem:[#allocation1 + $0xa] sm:$0x1]   ;;  %v129_v18 = vld [vmem:[#allocation1 + $0x7] sm:$0x1]   ;;  %67 = vst.msk [vmem:[#allocation0] sm:$0x1] %vm66_vm2, %v65_v16  }
   0xf   :  { %v87_v17 = vsel %vm76_vm1, %v85_v15, %v83_v14  ;;  %v135_v19 = vld [vmem:[#allocation1 + $0x15] sm:$0x1]   ;;  %v142_v20 = vld [vmem:[#allocation1 + $0x6] sm:$0x1]   ;;  %v148_v21 = vld [vmem:[#allocation1 + $0x14] sm:$0x1]  }
  0x10   :  { %123 = vrot.lane.b32.xlu0 %v122_v8, %s297_s11  ;;  %104 = vrot.lane.b32.xlu1 %v103_v9, %s298_s12  ;;  %v155_v22 = vld [vmem:[#allocation1 + $0x5] sm:$0x1]   ;;  %v161_v23 = vld [vmem:[#allocation1 + $0x13] sm:$0x1]   ;;  %v168_v24 = vld [vmem:[#allocation1 + $0x4] sm:$0x1]  }
  0x11   :  { %v174_v25 = vld [vmem:[#allocation1 + $0x12] sm:$0x1]   ;;  %v181_v26 = vld [vmem:[#allocation1 + $0x3] sm:$0x1]   ;;  %v187_v27 = vld [vmem:[#allocation1 + $0x11] sm:$0x1]  }
  0x12   :  { %v194_v28 = vld [vmem:[#allocation1 + $0x2] sm:$0x1]   ;;  %v200_v29 = vld [vmem:[#allocation1 + $0x1b] sm:$0x1]   ;;  %v207_v30 = vld [vmem:[#allocation1 + $0x10] sm:$0x1]  }
  0x13   :  { %v214_v31 = vld [vmem:[#allocation1 + $0x1] sm:$0x1]   ;;  %v220_v32 = vld [vmem:[#allocation1 + $0x1a] sm:$0x1]   ;;  %v227_v33 = vld [vmem:[#allocation1 + $0xb] sm:$0x1]  }
  0x14   :  { %74 = vrot.lane.b32.xlu0 %v73_v12, %s299_s13  ;;  %117 = vrot.lane.b32.xlu1 %v116_v13, %s300_s14  ;;  %s317_s2 = smov 4   ;;  %vm184_vm2 = vcmask 392480  }
  0x18   :  { %88 = vrot.lane.b32.xlu0 %v87_v17, %s301_s15  ;;  %130 = vrot.lane.b32.xlu1 %v129_v18, %s302_s16 }
  0x1c   :  { %136 = vrot.lane.b32.xlu0 %v135_v19, %s303_s17  ;;  %143 = vrot.lane.b32.xlu1 %v142_v20, %s304_s18 }
  0x20   :  { %149 = vrot.lane.b32.xlu0 %v148_v21, %s305_s19  ;;  %156 = vrot.lane.b32.xlu1 %v155_v22, %s306_s20 }
  0x24   :  { %162 = vrot.lane.b32.xlu0 %v161_v23, %s307_s21  ;;  %169 = vrot.lane.b32.xlu1 %v168_v24, %s308_s22 }
  0x28   :  { %175 = vrot.lane.b32.xlu0 %v174_v25, %s309_s23  ;;  %182 = vrot.lane.b32.xlu1 %v181_v26, %s310_s24 }
  0x2c   :  { %188 = vrot.lane.b32.xlu0 %v187_v27, %s311_s25  ;;  %195 = vrot.lane.b32.xlu1 %v194_v28, %s312_s26 }
  0x30   :  { %201 = vrot.lane.b32.xlu0 %v200_v29, %s313_s27  ;;  %208 = vrot.lane.b32.xlu1 %v207_v30, %s314_s28 }
  0x34   :  { %215 = vrot.lane.b32.xlu0 %v214_v31, %s315_s29  ;;  %221 = vrot.lane.b32.xlu1 %v220_v32, %s316_s30 }
  0x38   :  { %228 = vrot.lane.b32.xlu0 %v227_v33, %s317_s2 }
  0x7e   :  { %v111_v34 = vpop.permute.xlu0 %110   ;;  %v98_v35 = vpop.permute.xlu1 %97  }
  0x82   :  { %v124_v36 = vpop.permute.xlu0 %123   ;;  %v105_v37 = vpop.permute.xlu1 %104  }
  0x86   :  { %v75_v38 = vpop.permute.xlu0 %74   ;;  %v118_v39 = vpop.permute.xlu1 %117  }
  0x87   :  { %78 = vst.msk [vmem:[#allocation0 + $0x10] sm:$0x1] %vm76_vm1, %v75_v38   ;;  %vm177_vm1 = vcmask 425280  }
  0x88   :  { %81 = vst.msk [vmem:[#allocation0 + $0x8] sm:$0x1] %vm79_vm3, %v75_v38   ;;  %vm190_vm3 = vcmask 326880  }
  0x8a   :  { %v89_v40 = vpop.permute.xlu0 %88   ;;  %v131_v41 = vpop.permute.xlu1 %130  }
  0x8b   :  { %92 = vst.msk [vmem:[#allocation0 + $0x8] sm:$0x1] %vm72_vm0, %v89_v40   ;;  %vm171_vm0 = vcmask 490880  }
  0x8c   :  { %94 = vst.msk [vmem:[#allocation0] sm:$0x1] %vm93_vm4, %v89_v40   ;;  %vm197_vm4 = vcmask 294080  }
  0x8d   :  { %101 = vst.msk [vmem:[#allocation0 + $0x8] sm:$0x1] %vm99_vm5, %v98_v35   ;;  %vm203_vm5 = vcmask 261280  }
  0x8e   :  { %107 = vst.msk [vmem:[#allocation0] sm:$0x1] %vm106_vm6, %v105_v37   ;;  %v137_v42 = vpop.permute.xlu0 %136   ;;  %v144_v43 = vpop.permute.xlu1 %143   ;;  %vm210_vm6 = vcmask 228480  }
  0x8f   :  { %120 = vst.msk [vmem:[#allocation0] sm:$0x1] %vm119_vm8, %v118_v39   ;;  %vm223_vm8 = vcmask 162880  }
  0x90   :  { %114 = vst.msk [vmem:[#allocation0 + $0x8] sm:$0x1] %vm112_vm7, %v111_v34   ;;  %vm217_vm7 = vcmask 195680  }
  0x91   :  { %133 = vst.msk [vmem:[#allocation0] sm:$0x1] %vm132_vm10, %v131_v41  }
  0x92   :  { %127 = vst.msk [vmem:[#allocation0 + $0x8] sm:$0x1] %vm125_vm9, %v124_v36   ;;  %v150_v44 = vpop.permute.xlu0 %149   ;;  %v157_v45 = vpop.permute.xlu1 %156   ;;  %vm230_vm9 = vcmask 130080  }
  0x93   :  { %140 = vst.msk [vmem:[#allocation0 + $0x8] sm:$0x1] %vm138_vm11, %v137_v42  }
  0x94   :  { %146 = vst.msk [vmem:[#allocation0] sm:$0x1] %vm145_vm12, %v144_v43  }
  0x95   :  { %153 = vst.msk [vmem:[#allocation0 + $0x8] sm:$0x1] %vm151_vm13, %v150_v44  }
  0x96   :  { %159 = vst.msk [vmem:[#allocation0] sm:$0x1] %vm158_vm14, %v157_v45   ;;  %v163_v46 = vpop.permute.xlu0 %162   ;;  %v170_v47 = vpop.permute.xlu1 %169  }
  0x97   :  { %166 = vst.msk [vmem:[#allocation0 + $0x8] sm:$0x1] %vm164_vm15, %v163_v46  }
  0x98   :  { %172 = vst.msk [vmem:[#allocation0] sm:$0x1] %vm171_vm0, %v170_v47  }
  0x9a   :  { %v176_v48 = vpop.permute.xlu0 %175   ;;  %v183_v49 = vpop.permute.xlu1 %182  }
  0x9b   :  { %179 = vst.msk [vmem:[#allocation0 + $0x8] sm:$0x1] %vm177_vm1, %v176_v48  }
  0x9c   :  { %185 = vst.msk [vmem:[#allocation0] sm:$0x1] %vm184_vm2, %v183_v49  }
  0x9e   :  { %v189_v50 = vpop.permute.xlu0 %188   ;;  %v196_v51 = vpop.permute.xlu1 %195  }
  0x9f   :  { %192 = vst.msk [vmem:[#allocation0 + $0x8] sm:$0x1] %vm190_vm3, %v189_v50  }
  0xa0   :  { %198 = vst.msk [vmem:[#allocation0] sm:$0x1] %vm197_vm4, %v196_v51  }
  0xa2   :  { %v202_v52 = vpop.permute.xlu0 %201   ;;  %v209_v53 = vpop.permute.xlu1 %208  }
  0xa3   :  { %205 = vst.msk [vmem:[#allocation0 + $0x10] sm:$0x1] %vm203_vm5, %v202_v52  }
  0xa4   :  { %212 = vst.msk [vmem:[#allocation0 + $0x8] sm:$0x1] %vm210_vm6, %v209_v53  }
  0xa6   :  { %v216_v54 = vpop.permute.xlu0 %215   ;;  %v222_v55 = vpop.permute.xlu1 %221  }
  0xa7   :  { %218 = vst.msk [vmem:[#allocation0] sm:$0x1] %vm217_vm7, %v216_v54  }
  0xa8   :  { %225 = vst.msk [vmem:[#allocation0 + $0x10] sm:$0x1] %vm223_vm8, %v222_v55  }
  0xaa   :  { %v229_v56 = vpop.permute.xlu0 %228  }
  0xab   :  { %232 = vst.msk [vmem:[#allocation0 + $0x8] sm:$0x1] %vm230_vm9, %v229_v56  }
  0xae   :  { %v237_v57 = vld [vmem:[#allocation0] sm:$0x3] }
  0xaf   :  { %v248_v58 = vld [vmem:[#allocation0 + $0x10] sm:$0x3]  ;;  %v238_v60 = vpack.c.bf16 %v318_v59, %v237_v57 }
  0xb0   :  { %v249_v61 = vpack.c.bf16 %v318_v59, %v248_v58 }
  0xb1   :  { %240 = vst [vmem:[%s349_s1] sm:$0x1] %v238_v60 }
  0xb2   :  { %261 = vst [vmem:[%s349_s1 + $0x2] sm:$0x1] %v249_v61  ;;  %v242_v62 = vld [vmem:[#allocation0 + $0x8] sm:$0x3] }
  0xb3   :  { %v243_v63 = vpack.c.bf16 %v318_v59, %v242_v62 }
  0xb5   :  { %260 = vst [vmem:[%s349_s1 + $0x1] sm:$0x1] %v243_v63 }

// kernel: convnet_forward.3
= control target key start
LH: loop header
LB: loop body
LE: loop exit
PB: predicated region body
PF: predicated region fallthrough
CT: control target
= control target key end

     0   :  { %vm66_vm0 = vcmask 1043456   ;;  %vm67_vm1 = vcmask 1044480   ;;  %v682_v0 = vmov 0.0   ;;  %v683_v2 = vmov 65535   ;;  %s861_s2 = inlined_call_operand.vmem [shape: bf16[25,384], index: 2, kind: input, shape index: {}]   ;;  %s862_s0 = inlined_call_operand.vmem [shape: bf16[6,25], index: 0, kind: input, shape index: {}]   ;;  %s863_s3 = inlined_call_operand.vmem [shape: bf16[25,384], index: 3, kind: input, shape index: {}]   ;;  %s864_s4 = inlined_call_operand.vmem [shape: bf16[25,384], index: 4, kind: input, shape index: {}]   ;;  %s865_s5 = inlined_call_operand.vmem [shape: bf16[25,384], index: 5, kind: input, shape index: {}]   ;;  %s866_s1 = inlined_call_operand.vmem [shape: f32[6,1], index: 1, kind: input, shape index: {}]   ;;  %s867_s6 = inlined_call_operand.vmem [shape: f32[6,384], index: 6, kind: output, shape index: {}]  }
   0x1   :  { %613 = vmatprep.subr.bf16.mxu1 %v682_v0  ;;  %v650_v1 = vld [vmem:[%s861_s2 + $0x4] ss:$12 sps:$4 sm:$0xff]   ;;  %v68_v3 = vsel %vm66_vm0, 4294967295, %v683_v2  ;;  %v652_v4 = vld [vmem:[%s861_s2 + $0x8] ss:$12 sps:$4 sm:$0xff]   ;;  %vm684_vm2 = vmmov 0  }
   0x2   :  { %617 = vmatprep.mubr.msk.bf16.mxu1 %vm684_vm2, %v682_v0  ;;  %79 = vmatprep.subr.bf16.mxu0 %v650_v1  ;;  %v653_v5 = vld [vmem:[%s861_s2] ss:$12 sps:$4 sm:$0xff]   ;;  %v733_v6 = vsel %vm67_vm1, %v68_v3, 0  ;;  %v654_v7 = vld [vmem:[%s861_s2 + $0x1c] ss:$12 sps:$4 sm:$0x1f]  }
   0x3   :  { %614 = vmatpush3.bf16.msra.mxu1 %v652_v4  ;;  %80 = vmatpush1.bf16.msra.mxu0 %v653_v5  ;;  %v656_v8 = vld [vmem:[%s861_s2 + $0x20] ss:$12 sps:$4 sm:$0x1f]   ;;  %v74_v9 = vand.u32 %v654_v7, %v733_v6  ;;  %v657_v10 = vld [vmem:[%s861_s2 + $0x18] ss:$12 sps:$4 sm:$0x1f]  }
   0x4   :  { %615 = vmatprep.subr.bf16.mxu1 %v682_v0  ;;  %v685_v11 = vmov 0   ;;  %v77_v12 = vand.u32 %v656_v8, %v733_v6  ;;  %v752_v13 = vld [vmem:[%s862_s0] sm:$0x7]  ;;  %vm62_vm3 = vcmask 203776   ;;  %v660_v14 = vld [vmem:[%s863_s3 + $0x4] ss:$12 sps:$4 sm:$0xff]   ;;  %v71_v15 = vand.u32 %v657_v10, %v733_v6 }
   0x5   :  { %111 = vmatprep.mubr.bf16.mxu0 %v685_v11  ;;  %649 = vset.pattern.permute.xlu0 %v685_v11  ;;  %v658_v16 = vld [vmem:[%s863_s3] ss:$12 sps:$4 sm:$0xff]   ;;  %v661_v17 = vld [vmem:[%s863_s3 + $0x8] ss:$12 sps:$4 sm:$0xff]   ;;  %v668_v24 = vld [vmem:[%s864_s4 + $0x4] ss:$12 sps:$4 sm:$0xff]  }
   0x6   :  { %81 = vmatprep.subr.bf16.mxu0 %v74_v9  ;;  %v662_v18 = vld [vmem:[%s863_s3 + $0x18] ss:$12 sps:$4 sm:$0x1f]   ;;  %v664_v19 = vld [vmem:[%s863_s3 + $0x1c] ss:$12 sps:$4 sm:$0x1f]  }
   0x7   :  { %616 = vmatpush3.bf16.msra.mxu1 %v77_v12  ;;  %82 = vmatpush1.bf16.msra.mxu0 %v71_v15  ;;  %v665_v20 = vld [vmem:[%s863_s3 + $0x20] ss:$12 sps:$4 sm:$0x1f]   ;;  %v201_v21 = vand.u32 %v664_v19, %v733_v6  ;;  %v198_v23 = vand.u32 %v662_v18, %v733_v6  ;;  %v669_v25 = vld [vmem:[%s864_s4 + $0x8] ss:$12 sps:$4 sm:$0xff]  }
   0x8   :  { %621 = vmatprep.subr.bf16.mxu1 %v682_v0  ;;  %206 = vmatprep.subr.bf16.mxu0 %v660_v14  ;;  %v204_v22 = vand.u32 %v665_v20, %v733_v6  ;;  %v672_v26 = vld [vmem:[%s864_s4 + $0x1c] ss:$12 sps:$4 sm:$0x1f]   ;;  %v670_v27 = vld [vmem:[%s864_s4 + $0x18] ss:$12 sps:$4 sm:$0x1f]  }
   0x9   :  { %v673_v28 = vld [vmem:[%s864_s4 + $0x20] ss:$12 sps:$4 sm:$0x1f]   ;;  %v331_v30 = vand.u32 %v672_v26, %v733_v6  ;;  %v328_v33 = vand.u32 %v670_v27, %v733_v6  ;;  %v676_v34 = vld [vmem:[%s865_s5 + $0x4] ss:$12 sps:$4 sm:$0xff]  }
   0xa   :  { %618 = vmatmul.mubr.msk.bf16.vlgmr.msra.gmra.mrb[0].mxu1 %vm62_vm3, %v752_v13  ;;  %575 = vmatmul.mubr.msk.bf16.vlgmr.msra.gmra.mrb[0].mxu0 %vm62_vm3, %v752_v13  ;;  %v666_v29 = vld [vmem:[%s864_s4] ss:$12 sps:$4 sm:$0xff]   ;;  %v334_v31 = vand.u32 %v673_v28, %v733_v6  ;;  %v680_v35 = vld [vmem:[%s865_s5 + $0x1c] ss:$12 sps:$4 sm:$0x1f]  }
   0xb   :  { %622 = vmatpush3.bf16.msra.mxu1 %v661_v17  ;;  %207 = vmatpush1.bf16.msra.mxu0 %v658_v16  ;;  %v550_v32 = vld [vmem:[%s866_s1] sm:$0x3f]  ;;  %v677_v36 = vld [vmem:[%s865_s5 + $0x8] ss:$12 sps:$4 sm:$0xff]   ;;  %v461_v40 = vand.u32 %v680_v35, %v733_v6 }
   0xc   :  { %623 = vmatprep.subr.bf16.mxu1 %v682_v0  ;;  %208 = vmatprep.subr.bf16.mxu0 %v201_v21  ;;  %v681_v37 = vld [vmem:[%s865_s5 + $0x20] ss:$12 sps:$4 sm:$0x1f]   ;;  %v678_v39 = vld [vmem:[%s865_s5 + $0x18] ss:$12 sps:$4 sm:$0x1f]  }
   0xd   :  { %625 = vmatprep.mubr.msk.bf16.mxu1 %vm684_vm2, %v682_v0  ;;  %238 = vmatprep.mubr.bf16.mxu0 %v685_v11  ;;  %v674_v38 = vld [vmem:[%s865_s5] ss:$12 sps:$4 sm:$0xff]   ;;  %v464_v41 = vand.u32 %v681_v37, %v733_v6  ;;  %v458_v42 = vand.u32 %v678_v39, %v733_v6 }
   0xe   :  { %553 = vperm.xlu0 %649, %v550_v32  }
   0xf   :  { %624 = vmatpush3.bf16.msra.mxu1 %v204_v22  ;;  %209 = vmatpush1.bf16.msra.mxu0 %v198_v23 }
  0x10   :  { %629 = vmatprep.subr.bf16.mxu1 %v682_v0  ;;  %336 = vmatprep.subr.bf16.mxu0 %v668_v24 }
  0x12   :  { %626 = vmatmul.mubr.msk.bf16.vlgmr.msra.gmra.mrb[4].mxu1 %vm62_vm3, %v752_v13  ;;  %583 = vmatmul.mubr.msk.bf16.vlgmr.msra.gmra.mrb[4].mxu0 %vm62_vm3, %v752_v13 }
  0x13   :  { %630 = vmatpush3.bf16.msra.mxu1 %v669_v25  ;;  %337 = vmatpush1.bf16.msra.mxu0 %v666_v29 }
  0x14   :  { %631 = vmatprep.subr.bf16.mxu1 %v682_v0  ;;  %338 = vmatprep.subr.bf16.mxu0 %v331_v30 }
  0x15   :  { %633 = vmatprep.mubr.msk.bf16.mxu1 %vm684_vm2, %v682_v0  ;;  %368 = vmatprep.mubr.bf16.mxu0 %v685_v11 }
  0x17   :  { %632 = vmatpush3.bf16.msra.mxu1 %v334_v31  ;;  %339 = vmatpush1.bf16.msra.mxu0 %v328_v33 }
  0x18   :  { %637 = vmatprep.subr.bf16.mxu1 %v682_v0  ;;  %466 = vmatprep.subr.bf16.mxu0 %v676_v34 }
  0x1a   :  { %634 = vmatmul.mubr.msk.bf16.vlgmr.msra.gmra.mrb[8].mxu1 %vm62_vm3, %v752_v13  ;;  %591 = vmatmul.mubr.msk.bf16.vlgmr.msra.gmra.mrb[8].mxu0 %vm62_vm3, %v752_v13 }
  0x1b   :  { %638 = vmatpush3.bf16.msra.mxu1 %v677_v36  ;;  %467 = vmatpush1.bf16.msra.mxu0 %v674_v38 }
  0x1c   :  { %639 = vmatprep.subr.bf16.mxu1 %v682_v0  ;;  %468 = vmatprep.subr.bf16.mxu0 %v461_v40 }
  0x1d   :  { %641 = vmatprep.mubr.msk.bf16.mxu1 %vm684_vm2, %v682_v0  ;;  %498 = vmatprep.mubr.bf16.mxu0 %v685_v11 }
  0x1f   :  { %640 = vmatpush3.bf16.msra.mxu1 %v464_v41  ;;  %469 = vmatpush1.bf16.msra.mxu0 %v458_v42 }
  0x22   :  { %642 = vmatmul.mubr.msk.bf16.vlgmr.msra.gmra.mrb[12].mxu1 %vm62_vm3, %v752_v13  ;;  %599 = vmatmul.mubr.msk.bf16.vlgmr.msra.gmra.mrb[12].mxu0 %vm62_vm3, %v752_v13 }
  0x8d   :  { %v554_v10 = vpop.permute.xlu0 %553 }
  0xdd   :  { %v154_v43 = vpop.f32.mrb[0].mxu1  ;;  %v113_v44 = vpop.f32.mrb[0].mxu0 }
  0xde   :  { %v619_v45 = vpop.f32.mrb[1].mxu1  ;;  %v115_v46 = vpop.f32.mrb[1].mxu0 }
  0xdf   :  { %v157_v47 = vpop.f32.mrb[2].mxu1  ;;  %v117_v48 = vpop.f32.mrb[2].mxu0 }
  0xe0   :  { %v620_v49 = vpop.f32.mrb[3].mxu1  ;;  %v118_v50 = vpop.f32.mrb[3].mxu0 }
  0xe5   :  { %v281_v51 = vpop.f32.mrb[4].mxu1  ;;  %v240_v53 = vpop.f32.mrb[4].mxu0 }
  0xe6   :  { %v289_v52 = vmax.f32 %v154_v43, %v281_v51  ;;  %v627_v54 = vpop.f32.mrb[5].mxu1  ;;  %v287_v55 = vmax.f32 %v113_v44, %v240_v53  ;;  %v242_v56 = vpop.f32.mrb[5].mxu0 }
  0xe7   :  { %v284_v57 = vpop.f32.mrb[6].mxu1  ;;  %v288_v58 = vmax.f32 %v115_v46, %v242_v56  ;;  %v244_v59 = vpop.f32.mrb[6].mxu0 }
  0xe8   :  { %v628_v60 = vpop.f32.mrb[7].mxu1  ;;  %v245_v61 = vpop.f32.mrb[7].mxu0 }
  0xed   :  { %v411_v62 = vpop.f32.mrb[8].mxu1  ;;  %v370_v0 = vpop.f32.mrb[8].mxu0 }
  0xee   :  { %v419_v63 = vmax.f32 %v289_v52, %v411_v62  ;;  %v635_v1 = vpop.f32.mrb[9].mxu1  ;;  %v417_v2 = vmax.f32 %v287_v55, %v370_v0  ;;  %v372_v3 = vpop.f32.mrb[9].mxu0 }
  0xef   :  { %v414_v4 = vpop.f32.mrb[10].mxu1  ;;  %v418_v5 = vmax.f32 %v288_v58, %v372_v3  ;;  %v374_v6 = vpop.f32.mrb[10].mxu0 }
  0xf0   :  { %v636_v7 = vpop.f32.mrb[11].mxu1  ;;  %v375_v8 = vpop.f32.mrb[11].mxu0 }
  0xf5   :  { %v541_v9 = vpop.f32.mrb[12].mxu1  ;;  %v500_v12 = vpop.f32.mrb[12].mxu0 }
  0xf6   :  { %v549_v11 = vmax.f32 %v419_v63, %v541_v9  ;;  %v643_v13 = vpop.f32.mrb[13].mxu1  ;;  %v547_v14 = vmax.f32 %v417_v2, %v500_v12  ;;  %v502_v15 = vpop.f32.mrb[13].mxu0 }
  0xf7   :  { %v544_v16 = vpop.f32.mrb[14].mxu1  ;;  %v548_v18 = vmax.f32 %v418_v5, %v502_v15  ;;  %v504_v19 = vpop.f32.mrb[14].mxu0 }
  0xf8   :  { %v558_v17 = vadd.f32 %v554_v10, %v549_v11  ;;  %v644_v20 = vpop.f32.mrb[15].mxu1  ;;  %v556_v21 = vadd.f32 %v554_v10, %v547_v14  ;;  %v505_v22 = vpop.f32.mrb[15].mxu0 }
  0xf9   :  { %v557_v24 = vadd.f32 %v554_v10, %v548_v18 }
  0xfa   :  { %v561_v23 = vmax.f32 %v558_v17, 0.0  ;;  %v559_v25 = vmax.f32 %v556_v21, 0.0 }
  0xfb   :  { %v560_v26 = vmax.f32 %v557_v24, 0.0 }
  0xfc   :  { %564 = vst [vmem:[%s867_s6 + $0x10] sm:$0x3f] %v561_v23  ;;  %562 = vst [vmem:[%s867_s6] sm:$0x3f] %v559_v25 }
  0xfd   :  { %563 = vst [vmem:[%s867_s6 + $0x8] sm:$0x3f] %v560_v26 }

// kernel: convnet_forward.4
= control target key start
LH: loop header
LB: loop body
LE: loop exit
PB: predicated region body
PF: predicated region fallthrough
CT: control target
= control target key end

     0   :  { %v639_v0 = vmov 0   ;;  %vm111_vm0 = vcmask 179200   ;;  %vm115_vm1 = vcmask 1042432   ;;  %s868_s2 = inlined_call_operand.vmem [shape: bf16[150,128], index: 2, kind: input, shape index: {}]   ;;  %s869_s3 = inlined_call_operand.vmem [shape: bf16[150,128], index: 3, kind: input, shape index: {}]   ;;  %s870_s0 = inlined_call_operand.vmem [shape: bf16[16,150], index: 0, kind: input, shape index: {}]   ;;  %s871_s4 = inlined_call_operand.vmem [shape: bf16[150,128], index: 4, kind: input, shape index: {}]   ;;  %s872_s5 = inlined_call_operand.vmem [shape: bf16[150,128], index: 5, kind: input, shape index: {}]   ;;  %s873_s1 = inlined_call_operand.vmem [shape: f32[16,1], index: 1, kind: input, shape index: {}]   ;;  %s874_s6 = inlined_call_operand.vmem [shape: f32[16,128], index: 6, kind: output, shape index: {}]  }
   0x1   :  { %119 = vmatprep.subr.bf16.mxu0 %v639_v0  ;;  %239 = vmatprep.subr.bf16.mxu1 %v639_v0  ;;  %v596_v1 = vld [vmem:[%s868_s2] sm:$0xff]   ;;  %v598_v3 = vld [vmem:[%s868_s2 + $0x8] sm:$0xff]   ;;  %v600_v5 = vld [vmem:[%s868_s2 + $0x10] sm:$0xff]  }
   0x2   :  { %v597_v2 = vld [vmem:[%s869_s3] sm:$0xff]   ;;  %595 = vset.pattern.permute.xlu0 %v639_v0  ;;  %120 = vmatpush1.bf16.msra.mxu0 %v596_v1  ;;  %v599_v4 = vld [vmem:[%s869_s3 + $0x8] sm:$0xff]   ;;  %v601_v6 = vld [vmem:[%s869_s3 + $0x10] sm:$0xff]  }
   0x3   :  { %240 = vmatpush1.bf16.msra.mxu1 %v597_v2  ;;  %121 = vmatprep.subr.bf16.mxu0 %v639_v0  ;;  %v602_v7 = vld [vmem:[%s868_s2 + $0x18] sm:$0xff]   ;;  %v604_v9 = vld [vmem:[%s868_s2 + $0x20] sm:$0xff]   ;;  %v606_v11 = vld [vmem:[%s868_s2 + $0x28] sm:$0xff]  }
   0x4   :  { %241 = vmatprep.subr.bf16.mxu1 %v639_v0  ;;  %v603_v8 = vld [vmem:[%s869_s3 + $0x18] sm:$0xff]   ;;  %v605_v10 = vld [vmem:[%s869_s3 + $0x20] sm:$0xff]   ;;  %v607_v12 = vld [vmem:[%s869_s3 + $0x28] sm:$0xff]  }
   0x5   :  { %v616_v13 = vld [vmem:[%s870_s0 + $0x4] ss:$8 sps:$4 sm:$0xff]   ;;  %v608_v14 = vld [vmem:[%s868_s2 + $0x30] sm:$0xff]   ;;  %v610_v16 = vld [vmem:[%s868_s2 + $0x38] sm:$0xff]  }
   0x6   :  { %122 = vmatpush1.bf16.msra.mxu0 %v598_v3  ;;  %560 = vmatprep.mubr.msk.bf16.mxu0 %vm111_vm0, %v616_v13  ;;  %v609_v15 = vld [vmem:[%s869_s3 + $0x30] sm:$0xff]   ;;  %v611_v17 = vld [vmem:[%s869_s3 + $0x38] sm:$0xff]   ;;  %v614_v18 = vld [vmem:[%s868_s2 + $0x48] ss:$0 sps:$4 sm:$0x77]  }
   0x7   :  { %242 = vmatpush1.bf16.msra.mxu1 %v599_v4  ;;  %123 = vmatprep.subr.bf16.mxu0 %v639_v0  ;;  %v612_v19 = vld [vmem:[%s868_s2 + $0x40] sm:$0xff]   ;;  %v615_v20 = vld [vmem:[%s869_s3 + $0x48] ss:$0 sps:$4 sm:$0x77]   ;;  %v117_v22 = vsel %vm115_vm1, %v614_v18, 0  ;;  %v623_v31 = vld [vmem:[%s871_s4 + $0x10] sm:$0xff]  }
   0x8   :  { %243 = vmatprep.subr.bf16.mxu1 %v639_v0  ;;  %571 = vmatprep.mubr.msk.bf16.mxu1 %vm111_vm0, %v616_v13  ;;  %v613_v21 = vld [vmem:[%s869_s3 + $0x40] sm:$0xff]   ;;  %v237_v23 = vsel %vm115_vm1, %v615_v20, 0  ;;  %v621_v28 = vld [vmem:[%s871_s4 + $0x8] sm:$0xff]   ;;  %v624_v32 = vld [vmem:[%s872_s5 + $0x10] sm:$0xff]  }
   0x9   :  { %v766_v24 = vld [vmem:[%s870_s0] ss:$8 sps:$4 sm:$0xff]   ;;  %v625_v33 = vld [vmem:[%s871_s4 + $0x18] sm:$0xff]   ;;  %v631_v39 = vld [vmem:[%s871_s4 + $0x30] sm:$0xff]  }
   0xa   :  { %124 = vmatpush1.bf16.msra.mxu0 %v600_v5  ;;  %v619_v25 = vld [vmem:[%s871_s4] sm:$0xff]   ;;  %v527_v29 = vld [vmem:[%s873_s1 + $0x8] sm:$0xff]  ;;  %v626_v34 = vld [vmem:[%s872_s5 + $0x18] sm:$0xff]  }
   0xb   :  { %244 = vmatpush1.bf16.msra.mxu1 %v601_v6  ;;  %125 = vmatprep.subr.bf16.mxu0 %v639_v0  ;;  %v620_v26 = vld [vmem:[%s872_s5] sm:$0xff]   ;;  %v622_v30 = vld [vmem:[%s872_s5 + $0x8] sm:$0xff]   ;;  %v632_v40 = vld [vmem:[%s872_s5 + $0x30] sm:$0xff]  }
   0xc   :  { %245 = vmatprep.subr.bf16.mxu1 %v639_v0  ;;  %v526_v27 = vld [vmem:[%s873_s1] sm:$0xff]  ;;  %v629_v37 = vld [vmem:[%s871_s4 + $0x28] sm:$0xff]   ;;  %v633_v41 = vld [vmem:[%s871_s4 + $0x38] sm:$0xff]  }
   0xd   :  { %530 = vperm.xlu0 %595, %v526_v27   ;;  %v627_v35 = vld [vmem:[%s871_s4 + $0x20] sm:$0xff]   ;;  %v630_v38 = vld [vmem:[%s872_s5 + $0x28] sm:$0xff]   ;;  %v634_v42 = vld [vmem:[%s872_s5 + $0x38] sm:$0xff]  }
   0xe   :  { %126 = vmatpush1.bf16.msra.mxu0 %v602_v7  ;;  %v628_v36 = vld [vmem:[%s872_s5 + $0x20] sm:$0xff]   ;;  %v637_v45 = vld [vmem:[%s871_s4 + $0x48] ss:$0 sps:$4 sm:$0x77]  }
   0xf   :  { %246 = vmatpush1.bf16.msra.mxu1 %v603_v8  ;;  %127 = vmatprep.subr.bf16.mxu0 %v639_v0  ;;  %v635_v43 = vld [vmem:[%s871_s4 + $0x40] sm:$0xff]   ;;  %v638_v46 = vld [vmem:[%s872_s5 + $0x48] ss:$0 sps:$4 sm:$0x77]   ;;  %v359_v47 = vsel %vm115_vm1, %v637_v45, 0 }
  0x10   :  { %247 = vmatprep.subr.bf16.mxu1 %v639_v0  ;;  %v636_v44 = vld [vmem:[%s872_s5 + $0x40] sm:$0xff]   ;;  %v481_v48 = vsel %vm115_vm1, %v638_v46, 0 }
  0x11   :  { %535 = vperm.xlu0 %595, %v527_v29  }
  0x12   :  { %128 = vmatpush1.bf16.msra.mxu0 %v604_v9 }
  0x13   :  { %248 = vmatpush1.bf16.msra.mxu1 %v605_v10  ;;  %129 = vmatprep.subr.bf16.mxu0 %v639_v0 }
  0x14   :  { %249 = vmatprep.subr.bf16.mxu1 %v639_v0 }
  0x16   :  { %130 = vmatpush1.bf16.msra.mxu0 %v606_v11 }
  0x17   :  { %250 = vmatpush1.bf16.msra.mxu1 %v607_v12  ;;  %131 = vmatprep.subr.bf16.mxu0 %v639_v0 }
  0x18   :  { %251 = vmatprep.subr.bf16.mxu1 %v639_v0 }
  0x1a   :  { %132 = vmatpush1.bf16.msra.mxu0 %v608_v14 }
  0x1b   :  { %252 = vmatpush1.bf16.msra.mxu1 %v609_v15  ;;  %133 = vmatprep.subr.bf16.mxu0 %v639_v0 }
  0x1c   :  { %253 = vmatprep.subr.bf16.mxu1 %v639_v0 }
  0x1e   :  { %134 = vmatpush1.bf16.msra.mxu0 %v610_v16 }
  0x1f   :  { %254 = vmatpush1.bf16.msra.mxu1 %v611_v17  ;;  %135 = vmatprep.subr.bf16.mxu0 %v639_v0 }
  0x20   :  { %255 = vmatprep.subr.bf16.mxu1 %v639_v0 }
  0x22   :  { %136 = vmatpush1.bf16.msra.mxu0 %v612_v19 }
  0x23   :  { %256 = vmatpush1.bf16.msra.mxu1 %v613_v21  ;;  %137 = vmatprep.subr.bf16.mxu0 %v639_v0 }
  0x24   :  { %257 = vmatprep.subr.bf16.mxu1 %v639_v0 }
  0x26   :  { %138 = vmatpush1.bf16.msra.mxu0 %v117_v22 }
  0x27   :  { %258 = vmatpush1.bf16.msra.mxu1 %v237_v23  ;;  %361 = vmatprep.subr.bf16.mxu0 %v639_v0 }
  0x28   :  { %483 = vmatprep.subr.bf16.mxu1 %v639_v0 }
  0x29   :  { %152 = vmatmul.mubr.bf16.vlgmr.msra.gmra.mrb[0].mxu0 %v766_v24 }
  0x2a   :  { %272 = vmatmul.mubr.bf16.vlgmr.msra.gmra.mrb[0].mxu1 %v766_v24  ;;  %362 = vmatpush1.bf16.msra.mxu0 %v619_v25 }
  0x2b   :  { %484 = vmatpush1.bf16.msra.mxu1 %v620_v26  ;;  %363 = vmatprep.subr.bf16.mxu0 %v639_v0 }
  0x2c   :  { %485 = vmatprep.subr.bf16.mxu1 %v639_v0  ;;  %582 = vmatprep.mubr.msk.bf16.mxu0 %vm111_vm0, %v616_v13 }
  0x2d   :  { %593 = vmatprep.mubr.msk.bf16.mxu1 %vm111_vm0, %v616_v13 }
  0x2e   :  { %364 = vmatpush1.bf16.msra.mxu0 %v621_v28 }
  0x2f   :  { %486 = vmatpush1.bf16.msra.mxu1 %v622_v30  ;;  %365 = vmatprep.subr.bf16.mxu0 %v639_v0 }
  0x30   :  { %487 = vmatprep.subr.bf16.mxu1 %v639_v0 }
  0x32   :  { %366 = vmatpush1.bf16.msra.mxu0 %v623_v31 }
  0x33   :  { %488 = vmatpush1.bf16.msra.mxu1 %v624_v32  ;;  %367 = vmatprep.subr.bf16.mxu0 %v639_v0 }
  0x34   :  { %489 = vmatprep.subr.bf16.mxu1 %v639_v0 }
  0x36   :  { %368 = vmatpush1.bf16.msra.mxu0 %v625_v33 }
  0x37   :  { %490 = vmatpush1.bf16.msra.mxu1 %v626_v34  ;;  %369 = vmatprep.subr.bf16.mxu0 %v639_v0 }
  0x38   :  { %491 = vmatprep.subr.bf16.mxu1 %v639_v0 }
  0x3a   :  { %370 = vmatpush1.bf16.msra.mxu0 %v627_v35 }
  0x3b   :  { %492 = vmatpush1.bf16.msra.mxu1 %v628_v36  ;;  %371 = vmatprep.subr.bf16.mxu0 %v639_v0 }
  0x3c   :  { %493 = vmatprep.subr.bf16.mxu1 %v639_v0 }
  0x3e   :  { %372 = vmatpush1.bf16.msra.mxu0 %v629_v37 }
  0x3f   :  { %494 = vmatpush1.bf16.msra.mxu1 %v630_v38  ;;  %373 = vmatprep.subr.bf16.mxu0 %v639_v0 }
  0x40   :  { %495 = vmatprep.subr.bf16.mxu1 %v639_v0 }
  0x42   :  { %374 = vmatpush1.bf16.msra.mxu0 %v631_v39 }
  0x43   :  { %496 = vmatpush1.bf16.msra.mxu1 %v632_v40  ;;  %375 = vmatprep.subr.bf16.mxu0 %v639_v0 }
  0x44   :  { %497 = vmatprep.subr.bf16.mxu1 %v639_v0 }
  0x46   :  { %376 = vmatpush1.bf16.msra.mxu0 %v633_v41 }
  0x47   :  { %498 = vmatpush1.bf16.msra.mxu1 %v634_v42  ;;  %377 = vmatprep.subr.bf16.mxu0 %v639_v0 }
  0x48   :  { %499 = vmatprep.subr.bf16.mxu1 %v639_v0 }
  0x4a   :  { %378 = vmatpush1.bf16.msra.mxu0 %v635_v43 }
  0x4b   :  { %500 = vmatpush1.bf16.msra.mxu1 %v636_v44  ;;  %379 = vmatprep.subr.bf16.mxu0 %v639_v0 }
  0x4c   :  { %501 = vmatprep.subr.bf16.mxu1 %v639_v0 }
  0x4e   :  { %380 = vmatpush1.bf16.msra.mxu0 %v359_v47 }
  0x4f   :  { %502 = vmatpush1.bf16.msra.mxu1 %v481_v48 }
  0x51   :  { %394 = vmatmul.mubr.bf16.vlgmr.msra.gmra.mrb[4].mxu0 %v766_v24 }
  0x52   :  { %516 = vmatmul.mubr.bf16.vlgmr.msra.gmra.mrb[4].mxu1 %v766_v24 }
  0x8c   :  { %v531_v59 = vpop.permute.xlu0 %530 }
  0x90   :  { %v536_v9 = vpop.permute.xlu0 %535 }
  0xfc   :  { %v153_v49 = vpop.f32.mrb[0].mxu0 }
  0xfd   :  { %v273_v50 = vpop.f32.mrb[0].mxu1  ;;  %v155_v51 = vpop.f32.mrb[1].mxu0 }
  0xfe   :  { %v280_v52 = vmax.f32 %v153_v49, %v273_v50  ;;  %v275_v53 = vpop.f32.mrb[1].mxu1  ;;  %v156_v54 = vpop.f32.mrb[2].mxu0 }
  0xff   :  { %v276_v55 = vpop.f32.mrb[2].mxu1  ;;  %v158_v56 = vpop.f32.mrb[3].mxu0 }
 0x100   :  { %v281_v57 = vmax.f32 %v156_v54, %v276_v55  ;;  %v278_v58 = vpop.f32.mrb[3].mxu1 }
 0x124   :  { %v395_v60 = vpop.f32.mrb[4].mxu0 }
 0x125   :  { %v402_v61 = vmax.f32 %v280_v52, %v395_v60  ;;  %v517_v62 = vpop.f32.mrb[4].mxu1  ;;  %v397_v63 = vpop.f32.mrb[5].mxu0 }
 0x126   :  { %v519_v0 = vpop.f32.mrb[5].mxu1  ;;  %v398_v1 = vpop.f32.mrb[6].mxu0 }
 0x127   :  { %v524_v2 = vmax.f32 %v402_v61, %v517_v62  ;;  %v403_v3 = vmax.f32 %v281_v57, %v398_v1  ;;  %v520_v4 = vpop.f32.mrb[6].mxu1  ;;  %v400_v5 = vpop.f32.mrb[7].mxu0 }
 0x128   :  { %v522_v6 = vpop.f32.mrb[7].mxu1 }
 0x129   :  { %v538_v7 = vadd.f32 %v531_v59, %v524_v2  ;;  %v525_v8 = vmax.f32 %v403_v3, %v520_v4 }
 0x12b   :  { %v540_v10 = vmax.f32 %v538_v7, 0.0  ;;  %v539_v11 = vadd.f32 %v536_v9, %v525_v8 }
 0x12d   :  { %542 = vst [vmem:[%s874_s6] sm:$0xff] %v540_v10  ;;  %v541_v12 = vmax.f32 %v539_v11, 0.0 }
 0x12f   :  { %543 = vst [vmem:[%s874_s6 + $0x8] sm:$0xff] %v541_v12 }

// kernel: convnet_forward.5
= control target key start
LH: loop header
LB: loop body
LE: loop exit
PB: predicated region body
PF: predicated region fallthrough
CT: control target
= control target key end

     0   :  { %v590_v1 = vmov 0.0   ;;  %vm289_vm0 = vcmask 1043456   ;;  %vm591_vm1 = vmmov 0   ;;  %vm285_vm2 = vcmask 982016   ;;  %s759_s1 = inlined_call_operand.vmem [shape: bf16[256,120], index: 1, kind: input, shape index: {}]   ;;  %s760_s0 = inlined_call_operand.vmem [shape: bf16[16,256], index: 0, kind: input, shape index: {}]   ;;  %s761_s3 = inlined_call_operand.vmem [shape: bf16[120,84], index: 3, kind: input, shape index: {}]   ;;  %s762_s5 = inlined_call_operand.vmem [shape: bf16[84,10], index: 5, kind: input, shape index: {}]   ;;  %s763_s2 = inlined_call_operand.vmem [shape: f32[1,120], index: 2, kind: input, shape index: {}]   ;;  %s764_s4 = inlined_call_operand.vmem [shape: f32[1,84], index: 4, kind: input, shape index: {}]   ;;  %s765_s6 = inlined_call_operand.vmem [shape: f32[1,10], index: 6, kind: input, shape index: {}]   ;;  %s766_s7 = inlined_call_operand.vmem [shape: f32[16,10], index: 7, kind: output, shape index: {}]  }
   0x1   :  { %v557_v0 = vld [vmem:[%s759_s1 + $0x40] sm:$0xff]   ;;  %519 = vmatprep.subr.bf16.mxu1 %v590_v1  ;;  %v559_v3 = vld [vmem:[%s759_s1 + $0x48] sm:$0xff]   ;;  %v561_v5 = vld [vmem:[%s759_s1 + $0x50] sm:$0xff]   ;;  %535 = vmatprep.mubr.msk.bf16.mxu1 %vm591_vm1, %v590_v1  ;;  %vm392_vm3 = vcmask 1041408   ;;  %vm388_vm4 = vcmask 687104   ;;  %vm437_vm5 = vcmask 80896  }
   0x2   :  { %v558_v2 = vld [vmem:[%s759_s1] sm:$0xff]   ;;  %481 = vmatprep.subr.bf16.mxu0 %v557_v0  ;;  %v560_v4 = vld [vmem:[%s759_s1 + $0x8] sm:$0xff]   ;;  %v562_v6 = vld [vmem:[%s759_s1 + $0x10] sm:$0xff]  }
   0x3   :  { %482 = vmatpush3.bf16.msra.mxu0 %v558_v2  ;;  %v563_v7 = vld [vmem:[%s759_s1 + $0x58] sm:$0xff]   ;;  %v565_v9 = vld [vmem:[%s759_s1 + $0x60] sm:$0xff]   ;;  %v567_v11 = vld [vmem:[%s759_s1 + $0x68] sm:$0xff]  }
   0x4   :  { %483 = vmatprep.subr.bf16.mxu0 %v559_v3  ;;  %v564_v8 = vld [vmem:[%s759_s1 + $0x18] sm:$0xff]   ;;  %v566_v10 = vld [vmem:[%s759_s1 + $0x20] sm:$0xff]   ;;  %v568_v12 = vld [vmem:[%s759_s1 + $0x28] sm:$0xff]  }
   0x5   :  { %v575_v13 = vld [vmem:[%s760_s0 + $0x4] ss:$8 sps:$4 sm:$0xff]   ;;  %v569_v15 = vld [vmem:[%s759_s1 + $0x70] sm:$0xff]   ;;  %v571_v18 = vld [vmem:[%s759_s1 + $0x78] sm:$0xff]  }
   0x6   :  { %v576_v14 = vld [vmem:[%s761_s3] sm:$0xff]   ;;  %206 = vmatprep.mubr.bf16.mxu0 %v575_v13  ;;  %v577_v16 = vld [vmem:[%s761_s3 + $0x8] sm:$0xff]   ;;  %v570_v17 = vld [vmem:[%s759_s1 + $0x30] sm:$0xff]  }
   0x7   :  { %484 = vmatpush3.bf16.msra.mxu0 %v560_v4  ;;  %520 = vmatpush3.bf16.msra.mxu1 %v576_v14  ;;  %v578_v19 = vld [vmem:[%s761_s3 + $0x10] sm:$0xff]   ;;  %v572_v20 = vld [vmem:[%s759_s1 + $0x38] sm:$0xff]   ;;  %v573_v22 = vld [vmem:[%s760_s0] ss:$8 sps:$4 sm:$0xff]  }
   0x8   :  { %485 = vmatprep.subr.bf16.mxu0 %v561_v5  ;;  %521 = vmatprep.subr.bf16.mxu1 %v590_v1  ;;  %v579_v21 = vld [vmem:[%s761_s3 + $0x18] sm:$0xff]   ;;  %v580_v23 = vld [vmem:[%s761_s3 + $0x20] sm:$0xff]   ;;  %v581_v24 = vld [vmem:[%s761_s3 + $0x28] sm:$0xff]  }
   0x9   :  { %v582_v25 = vld [vmem:[%s761_s3 + $0x30] sm:$0xff]   ;;  %v583_v26 = vld [vmem:[%s761_s3 + $0x38] ss:$0 sps:$4 sm:$0xff]   ;;  %v584_v28 = vld [vmem:[%s762_s5] sm:$0xff]  }
   0xa   :  { %v291_v27 = vsel %vm289_vm0, %v583_v26, 0  ;;  %v585_v29 = vld [vmem:[%s762_s5 + $0x8] sm:$0xff]   ;;  %v586_v30 = vld [vmem:[%s762_s5 + $0x10] sm:$0xff]   ;;  %v587_v31 = vld [vmem:[%s762_s5 + $0x18] sm:$0xff]  }
   0xb   :  { %486 = vmatpush3.bf16.msra.mxu0 %v562_v6  ;;  %522 = vmatpush3.bf16.msra.mxu1 %v577_v16  ;;  %v444_v33 = vld [vmem:[%s763_s2] ss:$0 sm:$0xff]  ;;  %v589_v45 = vld [vmem:[%s762_s5 + $0x28] ss:$0 sps:$4 sm:$0x33]  }
   0xc   :  { %487 = vmatprep.subr.bf16.mxu0 %v563_v7  ;;  %523 = vmatprep.subr.bf16.mxu1 %v590_v1  ;;  %v588_v44 = vld [vmem:[%s762_s5 + $0x20] sm:$0xff]   ;;  %v394_v46 = vsel %vm392_vm3, %v589_v45, 0 }
   0xd   :  { %v463_v47 = vld [vmem:[%s764_s4] ss:$0 sm:$0xff] }
   0xe   :  { %v473_v57 = vld [vmem:[%s765_s6] ss:$0 sm:$0xff] }
   0xf   :  { %488 = vmatpush3.bf16.msra.mxu0 %v564_v8  ;;  %524 = vmatpush3.bf16.msra.mxu1 %v578_v19 }
  0x10   :  { %489 = vmatprep.subr.bf16.mxu0 %v565_v9  ;;  %525 = vmatprep.subr.bf16.mxu1 %v590_v1 }
  0x13   :  { %490 = vmatpush3.bf16.msra.mxu0 %v566_v10  ;;  %526 = vmatpush3.bf16.msra.mxu1 %v579_v21 }
  0x14   :  { %491 = vmatprep.subr.bf16.mxu0 %v567_v11  ;;  %527 = vmatprep.subr.bf16.mxu1 %v590_v1 }
  0x17   :  { %492 = vmatpush3.bf16.msra.mxu0 %v568_v12  ;;  %528 = vmatpush3.bf16.msra.mxu1 %v580_v23 }
  0x18   :  { %493 = vmatprep.subr.bf16.mxu0 %v569_v15  ;;  %529 = vmatprep.subr.bf16.mxu1 %v590_v1 }
  0x1b   :  { %494 = vmatpush3.bf16.msra.mxu0 %v570_v17  ;;  %530 = vmatpush3.bf16.msra.mxu1 %v581_v24 }
  0x1c   :  { %495 = vmatprep.subr.bf16.mxu0 %v571_v18  ;;  %531 = vmatprep.subr.bf16.mxu1 %v590_v1 }
  0x1f   :  { %496 = vmatpush3.bf16.msra.mxu0 %v572_v20  ;;  %532 = vmatpush3.bf16.msra.mxu1 %v582_v25 }
  0x20   :  { %539 = vmatprep.subr.bf16.mxu0 %v590_v1  ;;  %533 = vmatprep.subr.bf16.mxu1 %v590_v1 }
  0x22   :  { %207 = vmatmul.mubr.bf16.vlgmr.msra.gmra.mrb[0].mxu0 %v573_v22 }
  0x23   :  { %534 = vmatpush3.bf16.msra.mxu1 %v291_v27  ;;  %551 = vmatprep.mubr.msk.bf16.mxu0 %vm591_vm1, %v590_v1 }
  0x24   :  { %540 = vmatpush3.bf16.msra.mxu0 %v584_v28 }
  0x25   :  { %541 = vmatprep.subr.bf16.mxu0 %v590_v1 }
  0x28   :  { %542 = vmatpush3.bf16.msra.mxu0 %v585_v29 }
  0x29   :  { %543 = vmatprep.subr.bf16.mxu0 %v590_v1 }
  0x2c   :  { %544 = vmatpush3.bf16.msra.mxu0 %v586_v30 }
  0x2d   :  { %545 = vmatprep.subr.bf16.mxu0 %v590_v1 }
  0x30   :  { %546 = vmatpush3.bf16.msra.mxu0 %v587_v31 }
  0x31   :  { %547 = vmatprep.subr.bf16.mxu0 %v590_v1 }
  0x34   :  { %548 = vmatpush3.bf16.msra.mxu0 %v588_v44 }
  0x35   :  { %549 = vmatprep.subr.bf16.mxu0 %v590_v1 }
  0x38   :  { %550 = vmatpush3.bf16.msra.mxu0 %v394_v46 }
  0xf5   :  { %v497_v32 = vpop.f32.mrb[0].mxu0 }
  0xf6   :  { %v498_v34 = vpop.f32.mrb[1].mxu0 }
  0xf7   :  { %v499_v35 = vadd.f32 %v498_v34, %v497_v32  ;;  %v500_v36 = vpop.f32.mrb[2].mxu0 }
  0xf8   :  { %v501_v37 = vpop.f32.mrb[3].mxu0 }
  0xf9   :  { %v209_v38 = vadd.f32 %v499_v35, %v444_v33  ;;  %v502_v39 = vadd.f32 %v501_v37, %v500_v36 }
  0xfb   :  { %v212_v40 = vadd.f32 %v502_v39, %v444_v33  ;;  %v215_v41 = vmax.f32 %v209_v38, 0.0 }
  0xfd   :  { %v216_v42 = vmax.f32 %v212_v40, 0.0 }
  0xff   :  { %v217_v43 = vpack.c.bf16 %v216_v42, %v215_v41 }
 0x101   :  { %536 = vmatmul.mubr.msk.bf16.vlgmr.msra.gmra.mrb[0].mxu1 %vm285_vm2, %v217_v43 }
 0x1d4   :  { %v327_v48 = vpop.f32.mrb[0].mxu1 }
 0x1d5   :  { %v328_v49 = vadd.f32 %v463_v47, %v327_v48  ;;  %v537_v50 = vpop.f32.mrb[1].mxu1 }
 0x1d6   :  { %v330_v51 = vpop.f32.mrb[2].mxu1 }
 0x1d7   :  { %v331_v52 = vadd.f32 %v463_v47, %v330_v51  ;;  %v538_v53 = vpop.f32.mrb[3].mxu1  ;;  %v334_v54 = vmax.f32 %v328_v49, 0.0 }
 0x1d9   :  { %v335_v55 = vmax.f32 %v331_v52, 0.0 }
 0x1db   :  { %v336_v56 = vpack.c.bf16 %v335_v55, %v334_v54 }
 0x1dd   :  { %552 = vmatmul.mubr.msk.bf16.vlgmr.msra.gmra.mrb[4].mxu0 %vm388_vm4, %v336_v56 }
 0x2b0   :  { %v430_v58 = vpop.f32.mrb[4].mxu0 }
 0x2b1   :  { %v431_v59 = vadd.f32 %v473_v57, %v430_v58  ;;  %v553_v60 = vpop.f32.mrb[5].mxu0 }
 0x2b2   :  { %v433_v61 = vpop.f32.mrb[6].mxu0 }
 0x2b3   :  { %438 = vst.msk [vmem:[%s766_s7] sm:$0xff] %vm437_vm5, %v431_v59  ;;  %v434_v62 = vadd.f32 %v473_v57, %v433_v61  ;;  %v554_v63 = vpop.f32.mrb[7].mxu0 }
 0x2b5   :  { %439 = vst.msk [vmem:[%s766_s7 + $0x8] sm:$0xff] %vm437_vm5, %v434_v62 }

</bundles_post_ra>
